<compile_context>
chip_gen: v7x
topology: tpu7x:2x2x1
jax: 0.10.0
libtpu: 0.0.40
codegen_flags: <defaults>
</compile_context>

<pallas_src>
from typing import NamedTuple, Any

import jax
import jax.numpy as jnp
from jax.experimental import pallas as pl
from jax.experimental.pallas import tpu as pltpu

_LANE = 128
_SUBLANE = 8
# Keep resident (single-buffered) params well under 1/3 of v7x's 64 MiB VMEM.
_RESIDENT_PARAM_BYTES_MAX = 20 * 2**20


def _round_up(x: int, m: int) -> int:
    return ((x + m - 1) // m) * m


def _cdiv(a: int, b: int) -> int:
    return -(-a // b)


class PreparedMLP(NamedTuple):
    weights: tuple          # padded (k_pad, n_pad) arrays in compute_dtype
    biases: tuple           # padded (1, n_pad) float32 arrays
    in_dim: int
    out_dim: int
    compute_dtype: Any


def prepare_mlp_params(weights, biases, compute_dtype=jnp.float32) -> PreparedMLP:
    """Pad/cast parameters ONCE (hoisted out of the per-forward path).

    weights[i]: (in_i, out_i) float32   (PyTorch Linear weight transposed)
    biases[i] : (out_i,)      float32
    Hidden/output feature dims are zero-padded to lane (128) multiples; the
    first layer's K stays equal to input_dim so x never needs a feature pad.
    Zero padding is exact: padded hidden columns stay 0 through ReLU and the
    padded output columns are never written to HBM.
    """
    assert len(weights) == len(biases) and len(weights) >= 1
    in_dim = weights[0].shape[0]
    out_dim = weights[-1].shape[1]
    wps, bps = [], []
    for i, (w, b) in enumerate(zip(weights, biases)):
        k, n = w.shape
        k_pad = in_dim if i == 0 else _round_up(k, _LANE)
        n_pad = _round_up(n, _LANE)
        wp = jnp.zeros((k_pad, n_pad), dtype=compute_dtype).at[:k, :n].set(
            w.astype(compute_dtype))
        bp = jnp.zeros((1, n_pad), dtype=jnp.float32).at[0, :n].set(
            b.astype(jnp.float32))
        wps.append(wp)
        bps.append(bp)
    return PreparedMLP(tuple(wps), tuple(bps), in_dim, out_dim, compute_dtype)


def _make_mlp_kernel(num_layers: int, sigmoid_output: bool, compute_dtype):
    """Kernel computing the whole MLP for one row-tile of x."""

    def kernel(*refs):
        x_ref = refs[0]
        o_ref = refs[-1]
        p_refs = refs[1:-1]            # interleaved (w0, b0, w1, b1, ...)
        out_dim = o_ref.shape[-1]

        h = x_ref[...].astype(compute_dtype)
        for i in range(num_layers):
            w = p_refs[2 * i][...]                       # (k_pad, n_pad)
            b = p_refs[2 * i + 1][...]                   # (1, n_pad) f32
            acc = jnp.dot(h, w, preferred_element_type=jnp.float32) + b
            if i < num_layers - 1:
                h = jnp.maximum(acc, 0.0).astype(compute_dtype)   # ReLU
            else:
                h = acc                                  # lane-padded f32 acc
        y = h[:, :out_dim]                               # narrow before store
        if sigmoid_output:
            y = jax.nn.sigmoid(y)
        o_ref[...] = y.astype(o_ref.dtype)

    return kernel


def _mlp_xla(x2d, params: PreparedMLP, sigmoid_output: bool):
    """Fused plain-XLA path (tiny M / oversized resident weights)."""
    h = x2d.astype(params.compute_dtype)
    n = len(params.weights)
    for i, (w, b) in enumerate(zip(params.weights, params.biases)):
        acc = jnp.dot(h, w, preferred_element_type=jnp.float32) + b
        if i < n - 1:
            h = jnp.maximum(acc, 0.0).astype(params.compute_dtype)
        else:
            h = acc
    y = h[:, :params.out_dim]
    if sigmoid_output:
        y = jax.nn.sigmoid(y)
    return y.astype(x2d.dtype)


def _choose_row_tiling(m: int, tile_rows):
    """Balanced row tiles: ragged remainder < 8 rows-per-step of waste."""
    if tile_rows is not None:
        tile_m = max(_SUBLANE, _round_up(int(tile_rows), _SUBLANE))
    else:
        m8 = _round_up(m, _SUBLANE)
        if m8 < 256:
            tile_m = m8                       # single step; no benefit to split
        else:
            # >= 2 steps (v7x has 2 TensorCores), ~<=1024 rows per tile.
            steps = max(2, _cdiv(m, 1024))
            tile_m = _round_up(_cdiv(m, steps), _SUBLANE)
    steps = _cdiv(m, tile_m)
    return tile_m, steps


def mlp_forward(x, params: PreparedMLP, *, sigmoid_output: bool = False,
                tile_rows=None, min_rows_for_pallas: int = 64,
                interpret: bool = False):
    """Applies the MLP to x of shape (..., input_dim)."""
    orig_shape = x.shape
    in_dim = orig_shape[-1]
    assert in_dim == params.in_dim, (in_dim, params.in_dim)
    out_dim = params.out_dim
    num_layers = len(params.weights)

    x2d = x.reshape(-1, in_dim)
    m = x2d.shape[0]

    param_bytes = sum(int(w.size) * w.dtype.itemsize for w in params.weights)
    param_bytes += sum(int(b.size) * b.dtype.itemsize for b in params.biases)

    if m < min_rows_for_pallas or param_bytes > _RESIDENT_PARAM_BYTES_MAX:
        # Tiny-M (overhead-bound) or weights too big to keep resident in VMEM.
        # TODO(synk): N/K-tiled Pallas grid for very large hidden dims.
        y2d = _mlp_xla(x2d, params, sigmoid_output)
        return y2d.reshape(*orig_shape[:-1], out_dim)

    tile_m, steps = _choose_row_tiling(m, tile_rows)

    flat_params = []
    for wp, bp in zip(params.weights, params.biases):
        flat_params += [wp, bp]

    kernel = _make_mlp_kernel(num_layers, sigmoid_output, params.compute_dtype)
    out_shape = jax.ShapeDtypeStruct((m, out_dim), x.dtype)
    itemsize_x = jnp.dtype(x.dtype).itemsize
    max_width = max(int(wp.shape[1]) for wp in params.weights)

    # First try single-buffered (fetched-once) params; if that lowering is
    # rejected, retry with default double-buffering (previous known-good).
    y2d = None
    for single_buffer_params in (True, False):
        try:
            in_specs = [pl.BlockSpec((tile_m, in_dim), lambda i: (i, 0))]
            for wp, bp in zip(params.weights, params.biases):
                if single_buffer_params:
                    in_specs.append(pl.BlockSpec(wp.shape, lambda i: (0, 0),
                                                 pipeline_mode=pl.Buffered(1)))
                    in_specs.append(pl.BlockSpec(bp.shape, lambda i: (0, 0),
                                                 pipeline_mode=pl.Buffered(1)))
                else:
                    in_specs.append(pl.BlockSpec(wp.shape, lambda i: (0, 0)))
                    in_specs.append(pl.BlockSpec(bp.shape, lambda i: (0, 0)))
            out_specs = pl.BlockSpec((tile_m, out_dim), lambda i: (i, 0))

            # VMEM budget (binding case: v7x, 64 MiB physical).
            n_param_bufs = 1 if single_buffer_params else 2
            est = 2 * tile_m * in_dim * itemsize_x        # x tile, double-buffered
            est += 2 * tile_m * out_dim * itemsize_x      # out tile, double-buffered
            est += n_param_bufs * param_bytes             # resident params
            est += 4 * tile_m * max_width * 4             # live f32 intermediates
            vmem_limit = int(min(64 * 2**20, max(2 * est, 16 * 2**20)))

            y2d = pl.pallas_call(
                kernel,
                out_shape=out_shape,
                grid_spec=pltpu.PrefetchScalarGridSpec(
                    num_scalar_prefetch=0,
                    grid=(steps,),
                    in_specs=in_specs,
                    out_specs=out_specs,
                ),
                compiler_params=pltpu.CompilerParams(
                    dimension_semantics=("parallel",),
                    vmem_limit_bytes=vmem_limit,
                ),
                interpret=interpret,
            )(x2d, *flat_params)
            break
        except Exception:
            if not single_buffer_params:
                raise

    return y2d.reshape(*orig_shape[:-1], out_dim)


def mlp_pallas(x, weights, biases, *, sigmoid_output: bool = False,
               compute_dtype=jnp.float32, **kwargs):
    """Convenience one-shot wrapper (prefer prepare_mlp_params + mlp_forward)."""
    params = prepare_mlp_params(weights, biases, compute_dtype)
    return mlp_forward(x, params, sigmoid_output=sigmoid_output, **kwargs)


def init_mlp_params(key, input_dim, hidden_dim, output_dim, num_layers):
    """Deterministic synthetic parameters with the same shapes as nn.Linear."""
    h = [hidden_dim] * (num_layers - 1)
    dims_in = [input_dim] + h
    dims_out = h + [output_dim]
    weights, biases = [], []
    for n_in, n_out in zip(dims_in, dims_out):
        key, kw, kb = jax.random.split(key, 3)
        # PyTorch Linear weight is (out, in); store transposed as (in, out).
        w = jax.random.normal(kw, (n_in, n_out), dtype=jnp.float32) * 0.05
        b = jax.random.normal(kb, (n_out,), dtype=jnp.float32) * 0.05
        weights.append(w)
        biases.append(b)
    return weights, biases


def mlp_reference(x, weights, biases, sigmoid_output=False):
    num_layers = len(weights)
    h = x
    for i, (w, b) in enumerate(zip(weights, biases)):
        h = h @ w + b
        if i < num_layers - 1:
            h = jnp.maximum(h, 0.0)
    if sigmoid_output:
        h = jax.nn.sigmoid(h)
    return h


if __name__ == "__main__":
    key = jax.random.PRNGKey(0)

    # SAM mask-decoder MLP head shapes:
    #   input_dim=32, hidden_dim=64, output_dim=16, num_layers=3
    input_dim, hidden_dim, output_dim, num_layers = 32, 64, 16, 3
    sigmoid_output = True

    key, kx = jax.random.split(key)
    x_small = jax.random.normal(kx, (2, 8, input_dim), dtype=jnp.float32)
    weights, biases = init_mlp_params(key, input_dim, hidden_dim, output_dim,
                                      num_layers)

    # Parameters are padded/cast ONCE and reused across all forward calls.
    params_f32 = prepare_mlp_params(weights, biases)

    # 1) Force the Pallas path at tiny M (grid=(1,)) to validate the kernel.
    y_small = jax.block_until_ready(
        mlp_forward(x_small, params_f32, sigmoid_output=sigmoid_output,
                    min_rows_for_pallas=0))
    y_small_ref = mlp_reference(x_small, weights, biases, sigmoid_output)
    assert y_small.shape == (2, 8, output_dim), y_small.shape
    assert jnp.allclose(y_small, y_small_ref, atol=1e-5, rtol=1e-5), \
        float(jnp.max(jnp.abs(y_small - y_small_ref)))

    # 2) Default dispatch at tiny M: fused XLA fast path (overhead-bound regime).
    y_small2 = jax.block_until_ready(
        mlp_forward(x_small, params_f32, sigmoid_output=sigmoid_output))
    assert jnp.allclose(y_small2, y_small_ref, atol=1e-5, rtol=1e-5)

    # 3) Larger M (=2100): balanced row tiles (3 x 704), ragged last tile handled
    #    by Pallas boundary masking, narrow (un-padded) HBM output, no wrapper
    #    pad/slice copies, parallel grid for v7x's two TensorCores.
    key, kx2 = jax.random.split(key)
    x_big = jax.random.normal(kx2, (3, 700, input_dim), dtype=jnp.float32)
    y_big = jax.block_until_ready(
        mlp_forward(x_big, params_f32, sigmoid_output=sigmoid_output))
    y_big_ref = mlp_reference(x_big, weights, biases, sigmoid_output)
    assert y_big.shape == (3, 700, output_dim), y_big.shape
    assert jnp.allclose(y_big, y_big_ref, atol=1e-5, rtol=1e-5), \
        float(jnp.max(jnp.abs(y_big - y_big_ref)))

    # 4) bf16 MXU-input path (recommended on v6e/v7x); f32 accumulation,
    #    loose tolerance vs. the f32 reference.
    params_bf16 = prepare_mlp_params(weights, biases, compute_dtype=jnp.bfloat16)
    y_bf16 = jax.block_until_ready(
        mlp_forward(x_big, params_bf16, sigmoid_output=sigmoid_output))
    assert jnp.allclose(y_bf16, y_big_ref, atol=5e-2, rtol=5e-2), \
        float(jnp.max(jnp.abs(y_bf16 - y_big_ref)))

    print("KERNEL_OK")
</pallas_src>

<mosaic_0001>
module attributes {stable_mosaic.version = 11 : i64} {
  func.func @kernel(%arg0: i32, %arg1: memref<16x32xf32, #tpu.memory_space<vmem>>, %arg2: memref<32x128xf32, #tpu.memory_space<vmem>>, %arg3: memref<1x128xf32, #tpu.memory_space<vmem>>, %arg4: memref<128x128xf32, #tpu.memory_space<vmem>>, %arg5: memref<1x128xf32, #tpu.memory_space<vmem>>, %arg6: memref<128x128xf32, #tpu.memory_space<vmem>>, %arg7: memref<1x128xf32, #tpu.memory_space<vmem>>, %arg8: memref<16x16xf32, #tpu.memory_space<vmem>>) attributes {dimension_semantics = [#tpu.dimension_semantics<parallel>], iteration_bounds = array<i64: 1>, scalar_prefetch = 0 : i64, scratch_operands = 0 : i64, tpu.core_type = #tpu.core_type<tc>, window_params = [{transform_indices = @transform_0, window_bounds = array<i64: 16, 32>}, {pipeline_mode = #tpu.pipeline_mode<synchronous>, transform_indices = @transform_1, window_bounds = array<i64: 32, 128>}, {pipeline_mode = #tpu.pipeline_mode<synchronous>, transform_indices = @transform_2, window_bounds = array<i64: 1, 128>}, {pipeline_mode = #tpu.pipeline_mode<synchronous>, transform_indices = @transform_3, window_bounds = array<i64: 128, 128>}, {pipeline_mode = #tpu.pipeline_mode<synchronous>, transform_indices = @transform_4, window_bounds = array<i64: 1, 128>}, {pipeline_mode = #tpu.pipeline_mode<synchronous>, transform_indices = @transform_5, window_bounds = array<i64: 128, 128>}, {pipeline_mode = #tpu.pipeline_mode<synchronous>, transform_indices = @transform_6, window_bounds = array<i64: 1, 128>}, {transform_indices = @transform_7, window_bounds = array<i64: 16, 16>}]} {
    %c0 = arith.constant 0 : index
    %c0_0 = arith.constant 0 : index
    %0 = vector.load %arg1[%c0, %c0_0] : memref<16x32xf32, #tpu.memory_space<vmem>>, vector<16x32xf32>
    %c0_1 = arith.constant 0 : index
    %c0_2 = arith.constant 0 : index
    %1 = vector.load %arg2[%c0_1, %c0_2] : memref<32x128xf32, #tpu.memory_space<vmem>>, vector<32x128xf32>
    %c0_3 = arith.constant 0 : index
    %c0_4 = arith.constant 0 : index
    %2 = vector.load %arg3[%c0_3, %c0_4] : memref<1x128xf32, #tpu.memory_space<vmem>>, vector<1x128xf32>
    %cst = arith.constant dense<0.000000e+00> : vector<16x128xf32>
    %3 = tpu.matmul %0, %1, %cst {dimension_numbers = #tpu.dot_dimension_numbers<[1], [0], [0], [1], [0, 0, 1, 1], [], []>} : vector<16x32xf32>, vector<32x128xf32>, vector<16x128xf32> -> vector<16x128xf32>
    %4 = vector.broadcast %2 : vector<1x128xf32> to vector<16x128xf32>
    %5 = arith.addf %3, %4 : vector<16x128xf32>
    %cst_5 = arith.constant 0.000000e+00 : f32
    %6 = vector.broadcast %cst_5 : f32 to vector<16x128xf32>
    %7 = arith.maximumf %5, %6 : vector<16x128xf32>
    %c0_6 = arith.constant 0 : index
    %c0_7 = arith.constant 0 : index
    %8 = vector.load %arg4[%c0_6, %c0_7] : memref<128x128xf32, #tpu.memory_space<vmem>>, vector<128x128xf32>
    %c0_8 = arith.constant 0 : index
    %c0_9 = arith.constant 0 : index
    %9 = vector.load %arg5[%c0_8, %c0_9] : memref<1x128xf32, #tpu.memory_space<vmem>>, vector<1x128xf32>
    %cst_10 = arith.constant dense<0.000000e+00> : vector<16x128xf32>
    %10 = tpu.matmul %7, %8, %cst_10 {dimension_numbers = #tpu.dot_dimension_numbers<[1], [0], [0], [1], [0, 0, 1, 1], [], []>} : vector<16x128xf32>, vector<128x128xf32>, vector<16x128xf32> -> vector<16x128xf32>
    %11 = vector.broadcast %9 : vector<1x128xf32> to vector<16x128xf32>
    %12 = arith.addf %10, %11 : vector<16x128xf32>
    %cst_11 = arith.constant 0.000000e+00 : f32
    %13 = vector.broadcast %cst_11 : f32 to vector<16x128xf32>
    %14 = arith.maximumf %12, %13 : vector<16x128xf32>
    %c0_12 = arith.constant 0 : index
    %c0_13 = arith.constant 0 : index
    %15 = vector.load %arg6[%c0_12, %c0_13] : memref<128x128xf32, #tpu.memory_space<vmem>>, vector<128x128xf32>
    %c0_14 = arith.constant 0 : index
    %c0_15 = arith.constant 0 : index
    %16 = vector.load %arg7[%c0_14, %c0_15] : memref<1x128xf32, #tpu.memory_space<vmem>>, vector<1x128xf32>
    %cst_16 = arith.constant dense<0.000000e+00> : vector<16x128xf32>
    %17 = tpu.matmul %14, %15, %cst_16 {dimension_numbers = #tpu.dot_dimension_numbers<[1], [0], [0], [1], [0, 0, 1, 1], [], []>} : vector<16x128xf32>, vector<128x128xf32>, vector<16x128xf32> -> vector<16x128xf32>
    %18 = vector.broadcast %16 : vector<1x128xf32> to vector<16x128xf32>
    %19 = arith.addf %17, %18 : vector<16x128xf32>
    %20 = vector.extract_strided_slice %19 {offsets = [0, 0], sizes = [16, 16], strides = [1, 1]} : vector<16x128xf32> to vector<16x16xf32>
    %21 = arith.negf %20 : vector<16x16xf32>
    %22 = math.exp %21 : vector<16x16xf32>
    %cst_17 = arith.constant 1.000000e+00 : f32
    %23 = vector.broadcast %cst_17 : f32 to vector<16x16xf32>
    %24 = arith.addf %23, %22 : vector<16x16xf32>
    %25 = arith.divf %23, %24 : vector<16x16xf32>
    %c0_18 = arith.constant 0 : index
    %c0_19 = arith.constant 0 : index
    %26 = vector.load %arg8[%c0_18, %c0_19] : memref<16x16xf32, #tpu.memory_space<vmem>>, vector<16x16xf32>
    tpu.vector_store %arg8[%c0_18, %c0_19], %25 {strides = array<i32>} : memref<16x16xf32, #tpu.memory_space<vmem>>, vector<16x16xf32>,
    return
  }
  func.func @transform_0(%arg0: i32) -> (i32, i32) {
    %c0_i32 = arith.constant 0 : i32
    %c0_i32_0 = arith.constant 0 : i32
    return %arg0, %c0_i32 : i32, i32
  }
  func.func @transform_1(%arg0: i32) -> (i32, i32) {
    %c0_i32 = arith.constant 0 : i32
    %c0_i32_0 = arith.constant 0 : i32
    %c0_i32_1 = arith.constant 0 : i32
    return %c0_i32, %c0_i32_0 : i32, i32
  }
  func.func @transform_2(%arg0: i32) -> (i32, i32) {
    %c0_i32 = arith.constant 0 : i32
    %c0_i32_0 = arith.constant 0 : i32
    %c0_i32_1 = arith.constant 0 : i32
    return %c0_i32, %c0_i32_0 : i32, i32
  }
  func.func @transform_3(%arg0: i32) -> (i32, i32) {
    %c0_i32 = arith.constant 0 : i32
    %c0_i32_0 = arith.constant 0 : i32
    %c0_i32_1 = arith.constant 0 : i32
    return %c0_i32, %c0_i32_0 : i32, i32
  }
  func.func @transform_4(%arg0: i32) -> (i32, i32) {
    %c0_i32 = arith.constant 0 : i32
    %c0_i32_0 = arith.constant 0 : i32
    %c0_i32_1 = arith.constant 0 : i32
    return %c0_i32, %c0_i32_0 : i32, i32
  }
  func.func @transform_5(%arg0: i32) -> (i32, i32) {
    %c0_i32 = arith.constant 0 : i32
    %c0_i32_0 = arith.constant 0 : i32
    %c0_i32_1 = arith.constant 0 : i32
    return %c0_i32, %c0_i32_0 : i32, i32
  }
  func.func @transform_6(%arg0: i32) -> (i32, i32) {
    %c0_i32 = arith.constant 0 : i32
    %c0_i32_0 = arith.constant 0 : i32
    %c0_i32_1 = arith.constant 0 : i32
    return %c0_i32, %c0_i32_0 : i32, i32
  }
  func.func @transform_7(%arg0: i32) -> (i32, i32) {
    %c0_i32 = arith.constant 0 : i32
    %c0_i32_0 = arith.constant 0 : i32
    return %arg0, %c0_i32 : i32, i32
  }
}

module attributes {stable_mosaic.version = 11 : i64} {
  func.func @kernel(%arg0: i32, %arg1: memref<16x32xf32, #tpu.memory_space<vmem>>, %arg2: memref<32x128xf32, #tpu.memory_space<vmem>>, %arg3: memref<1x128xf32, #tpu.memory_space<vmem>>, %arg4: memref<128x128xf32, #tpu.memory_space<vmem>>, %arg5: memref<1x128xf32, #tpu.memory_space<vmem>>, %arg6: memref<128x128xf32, #tpu.memory_space<vmem>>, %arg7: memref<1x128xf32, #tpu.memory_space<vmem>>, %arg8: memref<16x16xf32, #tpu.memory_space<vmem>>) attributes {dimension_semantics = [#tpu.dimension_semantics<parallel>], iteration_bounds = array<i64: 1>, scalar_prefetch = 0 : i64, scratch_operands = 0 : i64, tpu.core_type = #tpu.core_type<tc>, window_params = [{transform_indices = @transform_0, window_bounds = array<i64: 16, 32>}, {pipeline_mode = #tpu.pipeline_mode<synchronous>, transform_indices = @transform_1, window_bounds = array<i64: 32, 128>}, {pipeline_mode = #tpu.pipeline_mode<synchronous>, transform_indices = @transform_2, window_bounds = array<i64: 1, 128>}, {pipeline_mode = #tpu.pipeline_mode<synchronous>, transform_indices = @transform_3, window_bounds = array<i64: 128, 128>}, {pipeline_mode = #tpu.pipeline_mode<synchronous>, transform_indices = @transform_4, window_bounds = array<i64: 1, 128>}, {pipeline_mode = #tpu.pipeline_mode<synchronous>, transform_indices = @transform_5, window_bounds = array<i64: 128, 128>}, {pipeline_mode = #tpu.pipeline_mode<synchronous>, transform_indices = @transform_6, window_bounds = array<i64: 1, 128>}, {transform_indices = @transform_7, window_bounds = array<i64: 16, 16>}]} {
    %c0 = arith.constant 0 : index
    %c0_0 = arith.constant 0 : index
    %0 = vector.load %arg1[%c0, %c0_0] : memref<16x32xf32, #tpu.memory_space<vmem>>, vector<16x32xf32>
    %c0_1 = arith.constant 0 : index
    %c0_2 = arith.constant 0 : index
    %1 = vector.load %arg2[%c0_1, %c0_2] : memref<32x128xf32, #tpu.memory_space<vmem>>, vector<32x128xf32>
    %c0_3 = arith.constant 0 : index
    %c0_4 = arith.constant 0 : index
    %2 = vector.load %arg3[%c0_3, %c0_4] : memref<1x128xf32, #tpu.memory_space<vmem>>, vector<1x128xf32>
    %cst = arith.constant dense<0.000000e+00> : vector<16x128xf32>
    %3 = tpu.matmul %0, %1, %cst {dimension_numbers = #tpu.dot_dimension_numbers<[1], [0], [0], [1], [0, 0, 1, 1], [], []>} : vector<16x32xf32>, vector<32x128xf32>, vector<16x128xf32> -> vector<16x128xf32>
    %4 = vector.broadcast %2 : vector<1x128xf32> to vector<16x128xf32>
    %5 = arith.addf %3, %4 : vector<16x128xf32>
    %cst_5 = arith.constant 0.000000e+00 : f32
    %6 = vector.broadcast %cst_5 : f32 to vector<16x128xf32>
    %7 = arith.maximumf %5, %6 : vector<16x128xf32>
    %c0_6 = arith.constant 0 : index
    %c0_7 = arith.constant 0 : index
    %8 = vector.load %arg4[%c0_6, %c0_7] : memref<128x128xf32, #tpu.memory_space<vmem>>, vector<128x128xf32>
    %c0_8 = arith.constant 0 : index
    %c0_9 = arith.constant 0 : index
    %9 = vector.load %arg5[%c0_8, %c0_9] : memref<1x128xf32, #tpu.memory_space<vmem>>, vector<1x128xf32>
    %cst_10 = arith.constant dense<0.000000e+00> : vector<16x128xf32>
    %10 = tpu.matmul %7, %8, %cst_10 {dimension_numbers = #tpu.dot_dimension_numbers<[1], [0], [0], [1], [0, 0, 1, 1], [], []>} : vector<16x128xf32>, vector<128x128xf32>, vector<16x128xf32> -> vector<16x128xf32>
    %11 = vector.broadcast %9 : vector<1x128xf32> to vector<16x128xf32>
    %12 = arith.addf %10, %11 : vector<16x128xf32>
    %cst_11 = arith.constant 0.000000e+00 : f32
    %13 = vector.broadcast %cst_11 : f32 to vector<16x128xf32>
    %14 = arith.maximumf %12, %13 : vector<16x128xf32>
    %c0_12 = arith.constant 0 : index
    %c0_13 = arith.constant 0 : index
    %15 = vector.load %arg6[%c0_12, %c0_13] : memref<128x128xf32, #tpu.memory_space<vmem>>, vector<128x128xf32>
    %c0_14 = arith.constant 0 : index
    %c0_15 = arith.constant 0 : index
    %16 = vector.load %arg7[%c0_14, %c0_15] : memref<1x128xf32, #tpu.memory_space<vmem>>, vector<1x128xf32>
    %cst_16 = arith.constant dense<0.000000e+00> : vector<16x128xf32>
    %17 = tpu.matmul %14, %15, %cst_16 {dimension_numbers = #tpu.dot_dimension_numbers<[1], [0], [0], [1], [0, 0, 1, 1], [], []>} : vector<16x128xf32>, vector<128x128xf32>, vector<16x128xf32> -> vector<16x128xf32>
    %18 = vector.broadcast %16 : vector<1x128xf32> to vector<16x128xf32>
    %19 = arith.addf %17, %18 : vector<16x128xf32>
    %20 = vector.extract_strided_slice %19 {offsets = [0, 0], sizes = [16, 16], strides = [1, 1]} : vector<16x128xf32> to vector<16x16xf32>
    %21 = arith.negf %20 : vector<16x16xf32>
    %22 = math.exp %21 : vector<16x16xf32>
    %cst_17 = arith.constant 1.000000e+00 : f32
    %23 = vector.broadcast %cst_17 : f32 to vector<16x16xf32>
    %24 = arith.addf %23, %22 : vector<16x16xf32>
    %25 = arith.divf %23, %24 : vector<16x16xf32>
    %c0_18 = arith.constant 0 : index
    %c0_19 = arith.constant 0 : index
    %26 = vector.load %arg8[%c0_18, %c0_19] : memref<16x16xf32, #tpu.memory_space<vmem>>, vector<16x16xf32>
    tpu.vector_store %arg8[%c0_18, %c0_19], %25 {strides = array<i32>} : memref<16x16xf32, #tpu.memory_space<vmem>>, vector<16x16xf32>,
    return
  }
  func.func @transform_0(%arg0: i32) -> (i32, i32) {
    %c0_i32 = arith.constant 0 : i32
    %c0_i32_0 = arith.constant 0 : i32
    return %arg0, %c0_i32 : i32, i32
  }
  func.func @transform_1(%arg0: i32) -> (i32, i32) {
    %c0_i32 = arith.constant 0 : i32
    %c0_i32_0 = arith.constant 0 : i32
    %c0_i32_1 = arith.constant 0 : i32
    return %c0_i32, %c0_i32_0 : i32, i32
  }
  func.func @transform_2(%arg0: i32) -> (i32, i32) {
    %c0_i32 = arith.constant 0 : i32
    %c0_i32_0 = arith.constant 0 : i32
    %c0_i32_1 = arith.constant 0 : i32
    return %c0_i32, %c0_i32_0 : i32, i32
  }
  func.func @transform_3(%arg0: i32) -> (i32, i32) {
    %c0_i32 = arith.constant 0 : i32
    %c0_i32_0 = arith.constant 0 : i32
    %c0_i32_1 = arith.constant 0 : i32
    return %c0_i32, %c0_i32_0 : i32, i32
  }
  func.func @transform_4(%arg0: i32) -> (i32, i32) {
    %c0_i32 = arith.constant 0 : i32
    %c0_i32_0 = arith.constant 0 : i32
    %c0_i32_1 = arith.constant 0 : i32
    return %c0_i32, %c0_i32_0 : i32, i32
  }
  func.func @transform_5(%arg0: i32) -> (i32, i32) {
    %c0_i32 = arith.constant 0 : i32
    %c0_i32_0 = arith.constant 0 : i32
    %c0_i32_1 = arith.constant 0 : i32
    return %c0_i32, %c0_i32_0 : i32, i32
  }
  func.func @transform_6(%arg0: i32) -> (i32, i32) {
    %c0_i32 = arith.constant 0 : i32
    %c0_i32_0 = arith.constant 0 : i32
    %c0_i32_1 = arith.constant 0 : i32
    return %c0_i32, %c0_i32_0 : i32, i32
  }
  func.func @transform_7(%arg0: i32) -> (i32, i32) {
    %c0_i32 = arith.constant 0 : i32
    %c0_i32_0 = arith.constant 0 : i32
    return %arg0, %c0_i32 : i32, i32
  }
}

</mosaic_0001>

<bundles_post_ra>
// kernel: tpu_custom_call.1
= control target key start
LH: loop header
LB: loop body
LE: loop exit
PB: predicated region body
PF: predicated region fallthrough
CT: control target
= control target key end

     0   :  { %12 = vsyncpa [#allocation3], 0  ;;  %s893_s0 = inlined_call_operand.hbm [shape: f32[16,32], index: 0, kind: input, shape index: {}]   ;;  %s894_s1 = inlined_call_operand.hbm [shape: f32[32,128], index: 1, kind: input, shape index: {}]   ;;  %s895_s2 = inlined_call_operand.vmem [shape: f32[1,128], index: 2, kind: input, shape index: {}]   ;;  %s896_s3 = inlined_call_operand.hbm [shape: f32[128,128], index: 3, kind: input, shape index: {}]   ;;  %s897_s4 = inlined_call_operand.vmem [shape: f32[1,128], index: 4, kind: input, shape index: {}]   ;;  %s898_s5 = inlined_call_operand.hbm [shape: f32[128,128], index: 5, kind: input, shape index: {}]   ;;  %s899_s6 = inlined_call_operand.vmem [shape: f32[1,128], index: 6, kind: input, shape index: {}]   ;;  %s900_s7 = inlined_call_operand.hbm [shape: f32[16,16], index: 7, kind: output, shape index: {}]  }
   0x1   :  { %13 = vsyncpa [#allocation6], 0 }
   0x2   :  { %14 = vsyncpa [#allocation9], 0 }
   0x3   :  { %15 = vsyncpa [#allocation4], 0  ;;  %s746_s24 = smov [#allocation5]   ;;  %s747_s26 = smov [#allocation2]  }
   0x4   :  { %s33_s25 = sshll.u32 %s746_s24, 4  ;;  %s21_s27 = sshll.u32 %s747_s26, 4  ;;  %s34_s25 = int_to_ptr.vmem [resolvable:$true] %s33_s25  ;;  %s793_s27 = int_to_ptr.vmem [resolvable:$true] %s21_s27 }
   0x5   :  { %s628_s30 = scalar_lea.hbm %s894_s1, 512 }
   0x6   :  { %p629_p0 = scmp.ne.s32.totalorder %s894_s1, %s628_s30  ;;  %p632_p1 = scmp.lt.u32.totalorder %s628_s30, %s894_s1 }
   0x8   :  { %p634_p2 = pnand %p632_p1, %p629_p0 }
   0xa   :  { %637 = shalt.err (!%p634_p2)
}
   0xb   :  { %s638_s12 = scalar_lea.vmem %s34_s25, 512  ;;  %p643_p4 = scmp.lt.s32.totalorder %s34_s25, %s34_s25 }
   0xc   :  { %p639_p3 = scmp.ne.s32.totalorder %s34_s25, %s638_s12  ;;  %p644_p5 = scmp.lt.s32.totalorder %s638_s12, %s638_s12 }
   0xe   :  { %p645_p6 = por %p644_p5, %p643_p4 }
  0x10   :  { %p646_p7 = pnand %p645_p6, %p639_p3 }
  0x12   :  { %649 = shalt.err (!%p646_p7)
}
  0x13   :  { %s748_s13 = smov 128   ;;  %s749_s14 = smov 8  }
  0x14   :  { %39 = dma.hbm_to_vmem [thread:$0]  %s894_s1, 512, %s34_s25, [#allocation6], %s748_s13, %s748_s13, %s749_s14  }
  0x15   :  { %s650_s19 = scalar_lea.hbm %s893_s0, 256 }
  0x16   :  { %p651_p8 = scmp.ne.s32.totalorder %s893_s0, %s650_s19  ;;  %p654_p9 = scmp.lt.u32.totalorder %s650_s19, %s893_s0 }
  0x18   :  { %p656_p10 = pnand %p654_p9, %p651_p8 }
  0x1a   :  { %659 = shalt.err (!%p656_p10)
}
  0x1b   :  { %s660_s24 = scalar_lea.vmem %s793_s27, 256  ;;  %p665_p12 = scmp.lt.s32.totalorder %s793_s27, %s793_s27 }
  0x1c   :  { %p661_p11 = scmp.ne.s32.totalorder %s793_s27, %s660_s24  ;;  %p666_p13 = scmp.lt.s32.totalorder %s660_s24, %s660_s24 }
  0x1e   :  { %p667_p0 = por %p666_p13, %p665_p12 }
  0x20   :  { %p668_p1 = pnand %p667_p0, %p661_p11 }
  0x22   :  { %671 = shalt.err (!%p668_p1)
}
  0x23   :  { %27 = dma.hbm_to_vmem [thread:$0]  %s893_s0, 256, %s793_s27, [#allocation3], %s748_s13, %s748_s13, %s749_s14  }
  0x24   :  { %s750_s26 = smov [#allocation7]   ;;  %s751_s29 = smov [#allocation8]  }
  0x25   :  { %s47_s28 = sshll.u32 %s750_s26, 4  ;;  %s61_s30 = sshll.u32 %s751_s29, 4  ;;  %s48_s28 = int_to_ptr.vmem [resolvable:$true] %s47_s28  ;;  %s830_s30 = int_to_ptr.vmem [resolvable:$true] %s61_s30 }
  0x26   :  { %s672_s10 = scalar_lea.hbm %s896_s3, 2048 }
  0x27   :  { %p673_p2 = scmp.ne.s32.totalorder %s896_s3, %s672_s10  ;;  %p676_p3 = scmp.lt.u32.totalorder %s672_s10, %s896_s3 }
  0x29   :  { %p678_p4 = pnand %p676_p3, %p673_p2 }
  0x2b   :  { %681 = shalt.err (!%p678_p4)
}
  0x2c   :  { %s682_s0 = scalar_lea.vmem %s48_s28, 2048  ;;  %p687_p6 = scmp.lt.s32.totalorder %s48_s28, %s48_s28 }
  0x2d   :  { %p683_p5 = scmp.ne.s32.totalorder %s48_s28, %s682_s0  ;;  %p688_p7 = scmp.lt.s32.totalorder %s682_s0, %s682_s0 }
  0x2f   :  { %p689_p8 = por %p688_p7, %p687_p6 }
  0x31   :  { %p690_p9 = pnand %p689_p8, %p683_p5 }
  0x33   :  { %693 = shalt.err (!%p690_p9)
}
  0x34   :  { %53 = dma.hbm_to_vmem [thread:$0]  %s896_s3, 2048, %s48_s28, [#allocation6], %s748_s13, %s748_s13, %s749_s14  }
  0x35   :  { %s694_s20 = scalar_lea.hbm %s898_s5, 2048 }
  0x36   :  { %p695_p10 = scmp.ne.s32.totalorder %s898_s5, %s694_s20  ;;  %p698_p11 = scmp.lt.u32.totalorder %s694_s20, %s898_s5 }
  0x38   :  { %p700_p12 = pnand %p698_p11, %p695_p10 }
  0x3a   :  { %703 = shalt.err (!%p700_p12)
}
  0x3b   :  { %s704_s1 = scalar_lea.vmem %s830_s30, 2048  ;;  %p709_p0 = scmp.lt.s32.totalorder %s830_s30, %s830_s30 }
  0x3c   :  { %p705_p13 = scmp.ne.s32.totalorder %s830_s30, %s704_s1  ;;  %p710_p1 = scmp.lt.s32.totalorder %s704_s1, %s704_s1 }
  0x3e   :  { %p711_p2 = por %p710_p1, %p709_p0 }
  0x40   :  { %p712_p3 = pnand %p711_p2, %p705_p13 }
  0x42   :  { %715 = shalt.err (!%p712_p3)
}
  0x43   :  { %67 = dma.hbm_to_vmem [thread:$0]  %s898_s5, 2048, %s830_s30, [#allocation9], %s748_s13, %s748_s13, %s749_s14  }
  0x44   :  { %738 = dma.done.wait [#allocation3], 256  }
  0x45   :  { %739 = vsyncadd [#allocation3], 4294967040 }
  0x46   :  { %740 = dma.done.wait [#allocation6], 2560  }
  0x47   :  { %741 = vsyncadd [#allocation6], 4294964736 }
  0x48   :  { %742 = dma.done.wait [#allocation9], 2048  }
  0x49   :  { %743 = vsyncadd [#allocation9], 4294965248  ;;  %vm95_vm0 = vcmask 261120   ;;  %v84_v0 = vld [vmem:[#allocation5] sm:$0xff]  ;;  %v85_v1 = vld [vmem:[#allocation5 + $0x8] sm:$0xff]  ;;  %vm389_vm1 = vcmask 130048  }
  0x4a   :  { %v86_v2 = vld [vmem:[#allocation5 + $0x10] sm:$0xff]  ;;  %v541_v3 = vpack.c.bf16 %v85_v1, %v84_v0  ;;  %v87_v4 = vld [vmem:[#allocation5 + $0x18] sm:$0xff]  ;;  %v179_v7 = vld [vmem:[#allocation7] sm:$0xff] }
  0x4b   :  { %v82_v5 = vld [vmem:[#allocation2] sm:$0xff]  ;;  %v545_v6 = vpack.c.bf16 %v87_v4, %v86_v2  ;;  %v180_v8 = vld [vmem:[#allocation7 + $0x8] sm:$0xff]  ;;  %v182_v11 = vld [vmem:[#allocation7 + $0x18] sm:$0xff] }
  0x4c   :  { %468 = vmatprep.mubr.msk.f32.mxu0 %vm95_vm0, %v82_v5  ;;  %v181_v9 = vld [vmem:[#allocation7 + $0x10] sm:$0xff]  ;;  %542 = vmatprep.subr.bf16.mxu0 %v541_v3  ;;  %v549_v10 = vpack.c.bf16 %v180_v8, %v179_v7  ;;  %v183_v13 = vld [vmem:[#allocation7 + $0x20] sm:$0xff]  ;;  %v184_v14 = vld [vmem:[#allocation7 + $0x28] sm:$0xff] }
  0x4d   :  { %544 = vmatpush3.bf16.msra.mxu0 %v541_v3  ;;  %v553_v12 = vpack.c.bf16 %v182_v11, %v181_v9  ;;  %v557_v15 = vpack.c.bf16 %v184_v14, %v183_v13  ;;  %v83_v16 = vld [vmem:[#allocation2 + $0x8] sm:$0xff]  ;;  %v185_v17 = vld [vmem:[#allocation7 + $0x30] sm:$0xff]  ;;  %v187_v20 = vld [vmem:[#allocation7 + $0x40] sm:$0xff] }
  0x4e   :  { %546 = vmatprep.subr.bf16.mxu0 %v545_v6  ;;  %550 = vmatprep.subr.bf16.mxu1 %v549_v10  ;;  %v186_v18 = vld [vmem:[#allocation7 + $0x38] sm:$0xff]  ;;  %v188_v21 = vld [vmem:[#allocation7 + $0x48] sm:$0xff]  ;;  %v189_v23 = vld [vmem:[#allocation7 + $0x50] sm:$0xff] }
  0x4f   :  { %552 = vmatpush3.bf16.msra.mxu1 %v549_v10  ;;  %v561_v19 = vpack.c.bf16 %v186_v18, %v185_v17  ;;  %v565_v22 = vpack.c.bf16 %v188_v21, %v187_v20  ;;  %v190_v24 = vld [vmem:[#allocation7 + $0x58] sm:$0xff]  ;;  %v191_v26 = vld [vmem:[#allocation7 + $0x60] sm:$0xff]  ;;  %v192_v27 = vld [vmem:[#allocation7 + $0x68] sm:$0xff] }
  0x50   :  { %554 = vmatprep.subr.bf16.mxu1 %v553_v12  ;;  %v569_v25 = vpack.c.bf16 %v190_v24, %v189_v23  ;;  %v573_v28 = vpack.c.bf16 %v192_v27, %v191_v26  ;;  %v193_v29 = vld [vmem:[#allocation7 + $0x70] sm:$0xff]  ;;  %v194_v30 = vld [vmem:[#allocation7 + $0x78] sm:$0xff]  ;;  %v279_v32 = vld [vmem:[#allocation8] sm:$0xff] }
  0x51   :  { %548 = vmatpush3.bf16.msra.mxu0 %v545_v6  ;;  %v577_v31 = vpack.c.bf16 %v194_v30, %v193_v29  ;;  %v280_v33 = vld [vmem:[#allocation8 + $0x8] sm:$0xff]  ;;  %v281_v34 = vld [vmem:[#allocation8 + $0x10] sm:$0xff]  ;;  %v282_v36 = vld [vmem:[#allocation8 + $0x18] sm:$0xff] }
  0x52   :  { %v581_v35 = vpack.c.bf16 %v280_v33, %v279_v32  ;;  %v585_v37 = vpack.c.bf16 %v282_v36, %v281_v34  ;;  %v283_v38 = vld [vmem:[#allocation8 + $0x20] sm:$0xff]  ;;  %v284_v39 = vld [vmem:[#allocation8 + $0x28] sm:$0xff]  ;;  %v285_v41 = vld [vmem:[#allocation8 + $0x30] sm:$0xff] }
  0x53   :  { %556 = vmatpush3.bf16.msra.mxu1 %v553_v12  ;;  %v589_v40 = vpack.c.bf16 %v284_v39, %v283_v38  ;;  %v286_v42 = vld [vmem:[#allocation8 + $0x38] sm:$0xff]  ;;  %v287_v44 = vld [vmem:[#allocation8 + $0x40] sm:$0xff]  ;;  %v288_v45 = vld [vmem:[#allocation8 + $0x48] sm:$0xff] }
  0x54   :  { %469 = vmatmul.mubr.msk.f32.vlgmr.msra.gmra.mrb[0].mxu0 %vm95_vm0, %v83_v16  ;;  %558 = vmatprep.subr.bf16.mxu1 %v557_v15  ;;  %v593_v43 = vpack.c.bf16 %v286_v42, %v285_v41  ;;  %v597_v46 = vpack.c.bf16 %v288_v45, %v287_v44  ;;  %v289_v47 = vld [vmem:[#allocation8 + $0x50] sm:$0xff]  ;;  %v290_v48 = vld [vmem:[#allocation8 + $0x58] sm:$0xff]  ;;  %v291_v50 = vld [vmem:[#allocation8 + $0x60] sm:$0xff] }
  0x55   :  { %582 = vmatprep.subr.bf16.mxu0 %v581_v35  ;;  %v601_v49 = vpack.c.bf16 %v290_v48, %v289_v47  ;;  %v292_v51 = vld [vmem:[#allocation8 + $0x68] sm:$0xff]  ;;  %v411_v53 = vld [vmem:[%s895_s2] ss:$0 sm:$0xff]  ;;  %v294_v61 = vld [vmem:[#allocation8 + $0x78] sm:$0xff] }
  0x56   :  { %584 = vmatpush3.bf16.msra.mxu0 %v581_v35  ;;  %v605_v52 = vpack.c.bf16 %v292_v51, %v291_v50  ;;  %v293_v60 = vld [vmem:[#allocation8 + $0x70] sm:$0xff] }
  0x57   :  { %560 = vmatpush3.bf16.msra.mxu1 %v557_v15  ;;  %586 = vmatprep.subr.bf16.mxu0 %v585_v37  ;;  %v609_v62 = vpack.c.bf16 %v294_v61, %v293_v60  ;;  %v414_v63 = vld [vmem:[%s897_s4] ss:$0 sm:$0xff]  ;;  %s752_s4 = smov [#allocation10]  }
  0x58   :  { %562 = vmatprep.subr.bf16.mxu1 %v561_v19  ;;  %v415_v6 = vld [vmem:[%s899_s6] ss:$0 sm:$0xff]  ;;  %s397_s8 = sshll.u32 %s752_s4, 4  ;;  %s398_s8 = int_to_ptr.vmem [resolvable:$true] %s397_s8 }
  0x59   :  { %s716_s6 = scalar_lea.vmem %s398_s8, 256  ;;  %p721_p5 = scmp.lt.s32.totalorder %s398_s8, %s398_s8 }
  0x5a   :  { %588 = vmatpush3.bf16.msra.mxu0 %v585_v37  ;;  %p717_p4 = scmp.ne.s32.totalorder %s398_s8, %s716_s6  ;;  %p722_p6 = scmp.lt.s32.totalorder %s716_s6, %s716_s6 }
  0x5b   :  { %564 = vmatpush3.bf16.msra.mxu1 %v561_v19  ;;  %590 = vmatprep.subr.bf16.mxu0 %v589_v40 }
  0x5c   :  { %566 = vmatprep.subr.bf16.mxu1 %v565_v22  ;;  %p723_p7 = por %p722_p6, %p721_p5 }
  0x5e   :  { %592 = vmatpush3.bf16.msra.mxu0 %v589_v40  ;;  %p724_p8 = pnand %p723_p7, %p717_p4 }
  0x5f   :  { %568 = vmatpush3.bf16.msra.mxu1 %v565_v22  ;;  %594 = vmatprep.subr.bf16.mxu0 %v593_v43 }
  0x60   :  { %570 = vmatprep.subr.bf16.mxu1 %v569_v25 }
  0x62   :  { %596 = vmatpush3.bf16.msra.mxu0 %v593_v43 }
  0x63   :  { %572 = vmatpush3.bf16.msra.mxu1 %v569_v25  ;;  %598 = vmatprep.subr.bf16.mxu0 %v597_v46 }
  0x64   :  { %574 = vmatprep.subr.bf16.mxu1 %v573_v28 }
  0x66   :  { %600 = vmatpush3.bf16.msra.mxu0 %v597_v46 }
  0x67   :  { %576 = vmatpush3.bf16.msra.mxu1 %v573_v28  ;;  %602 = vmatprep.subr.bf16.mxu0 %v601_v49 }
  0x68   :  { %578 = vmatprep.subr.bf16.mxu1 %v577_v31 }
  0x6a   :  { %604 = vmatpush3.bf16.msra.mxu0 %v601_v49 }
  0x6b   :  { %580 = vmatpush3.bf16.msra.mxu1 %v577_v31  ;;  %606 = vmatprep.subr.bf16.mxu0 %v605_v52 }
  0x6e   :  { %608 = vmatpush3.bf16.msra.mxu0 %v605_v52 }
  0x6f   :  { %610 = vmatprep.subr.bf16.mxu0 %v609_v62 }
  0x72   :  { %612 = vmatpush3.bf16.msra.mxu0 %v609_v62 }
 0x127   :  { %v470_v54 = vpop.f32.mrb[0].mxu0 }
 0x128   :  { %v174_v55 = vadd.f32 %v470_v54, %v411_v53  ;;  %v168_v56 = vpop.f32.mrb[1].mxu0 }
 0x129   :  { %v169_v57 = vadd.f32 %v411_v53, %v168_v56 }
 0x12a   :  { %v178_v59 = vmax.f32 %v174_v55, 0.0 }
 0x12b   :  { %v177_v58 = vmax.f32 %v169_v57, 0.0 }
 0x12d   :  { %503 = vmatprep.mubr.f32.mxu1 %v177_v58 }
 0x12e   :  { %504 = vmatmul.mubr.f32.vlgmr.msra.gmra.mrb[0].mxu1 %v178_v59 }
 0x201   :  { %v505_v0 = vpop.f32.mrb[0].mxu1 }
 0x202   :  { %v274_v1 = vadd.f32 %v505_v0, %v414_v63  ;;  %v268_v2 = vpop.f32.mrb[1].mxu1 }
 0x203   :  { %v269_v3 = vadd.f32 %v414_v63, %v268_v2 }
 0x204   :  { %v278_v5 = vmax.f32 %v274_v1, 0.0 }
 0x205   :  { %v277_v4 = vmax.f32 %v269_v3, 0.0 }
 0x207   :  { %538 = vmatprep.mubr.f32.mxu0 %v277_v4 }
 0x208   :  { %539 = vmatmul.mubr.f32.vlgmr.msra.gmra.mrb[2].mxu0 %v278_v5 }
 0x2db   :  { %v540_v7 = vpop.f32.mrb[2].mxu0 }
 0x2dc   :  { %v374_v8 = vadd.f32 %v540_v7, %v415_v6  ;;  %v368_v9 = vpop.f32.mrb[3].mxu0 }
 0x2dd   :  { %v369_v10 = vadd.f32 %v415_v6, %v368_v9 }
 0x2de   :  { %v417_v11 = vmul.f32 -1.442695, %v374_v8 }
 0x2df   :  { %v416_v12 = vmul.f32 -1.442695, %v369_v10 }
 0x2e0   :  { %620 = vpow2.f32 %v417_v11 }
 0x2e1   :  { %622 = vpow2.f32 %v416_v12 }
 0x2ea   :  { %v621_v13 = vpop.eup %620 }
 0x2eb   :  { %v623_v14 = vpop.eup %622  ;;  %v384_v15 = vadd.f32 1.0, %v621_v13 }
 0x2ec   :  { %v383_v16 = vadd.f32 1.0, %v623_v14 }
 0x2ed   :  { %624 = vrcp.f32 %v384_v15 }
 0x2ee   :  { %626 = vrcp.f32 %v383_v16 }
 0x2f7   :  { %v625_v17 = vpop.eup %624 }
 0x2f8   :  { %v627_v18 = vpop.eup %626  ;;  %391 = vst.msk [vmem:[#allocation10 + $0x8] sm:$0xff] %vm389_vm1, %v625_v17 }
 0x2f9   :  { %390 = vst.msk [vmem:[#allocation10] sm:$0xff] %vm389_vm1, %v627_v18 }
 0x2fa   :  { %727 = shalt.err (!%p724_p8)
}
 0x2fb   :  { %s728_s11 = scalar_lea.hbm %s900_s7, 256 }
 0x2fc   :  { %p729_p9 = scmp.ne.s32.totalorder %s900_s7, %s728_s11  ;;  %p732_p10 = scmp.lt.u32.totalorder %s728_s11, %s900_s7 }
 0x2fe   :  { %p734_p11 = pnand %p732_p10, %p729_p9 }
 0x300   :  { %737 = shalt.err (!%p734_p11)
}
 0x301   :  { %403 = dma.vmem_to_hbm [thread:$0]  %s398_s8, 256, %s900_s7, [#allocation4], %s748_s13, %s748_s13, %s749_s14  }
 0x302   :  { %744 = dma.done.wait [#allocation4], 256  }
 0x303   :  { %745 = vsyncadd [#allocation4], 4294967040 }
 0x304   :  { %407 = vsyncpa [#allocation3], 1 }
 0x305   :  { %408 = vsyncpa [#allocation6], 1 }
 0x306   :  { %409 = vsyncpa [#allocation9], 1 }
 0x307   :  { %410 = vsyncpa [#allocation4], 1 }

// kernel: tpu_custom_call.1
= control target key start
LH: loop header
LB: loop body
LE: loop exit
PB: predicated region body
PF: predicated region fallthrough
CT: control target
= control target key end

     0   :  { %12 = vsyncpa [#allocation3], 0  ;;  %s893_s0 = inlined_call_operand.hbm [shape: f32[16,32], index: 0, kind: input, shape index: {}]   ;;  %s894_s1 = inlined_call_operand.hbm [shape: f32[32,128], index: 1, kind: input, shape index: {}]   ;;  %s895_s2 = inlined_call_operand.vmem [shape: f32[1,128], index: 2, kind: input, shape index: {}]   ;;  %s896_s3 = inlined_call_operand.hbm [shape: f32[128,128], index: 3, kind: input, shape index: {}]   ;;  %s897_s4 = inlined_call_operand.vmem [shape: f32[1,128], index: 4, kind: input, shape index: {}]   ;;  %s898_s5 = inlined_call_operand.hbm [shape: f32[128,128], index: 5, kind: input, shape index: {}]   ;;  %s899_s6 = inlined_call_operand.vmem [shape: f32[1,128], index: 6, kind: input, shape index: {}]   ;;  %s900_s7 = inlined_call_operand.hbm [shape: f32[16,16], index: 7, kind: output, shape index: {}]  }
   0x1   :  { %13 = vsyncpa [#allocation6], 0 }
   0x2   :  { %14 = vsyncpa [#allocation9], 0 }
   0x3   :  { %15 = vsyncpa [#allocation4], 0  ;;  %s746_s24 = smov [#allocation5]   ;;  %s747_s26 = smov [#allocation2]  }
   0x4   :  { %s33_s25 = sshll.u32 %s746_s24, 4  ;;  %s21_s27 = sshll.u32 %s747_s26, 4  ;;  %s34_s25 = int_to_ptr.vmem [resolvable:$true] %s33_s25  ;;  %s793_s27 = int_to_ptr.vmem [resolvable:$true] %s21_s27 }
   0x5   :  { %s628_s30 = scalar_lea.hbm %s894_s1, 512 }
   0x6   :  { %p629_p0 = scmp.ne.s32.totalorder %s894_s1, %s628_s30  ;;  %p632_p1 = scmp.lt.u32.totalorder %s628_s30, %s894_s1 }
   0x8   :  { %p634_p2 = pnand %p632_p1, %p629_p0 }
   0xa   :  { %637 = shalt.err (!%p634_p2)
}
   0xb   :  { %s638_s12 = scalar_lea.vmem %s34_s25, 512  ;;  %p643_p4 = scmp.lt.s32.totalorder %s34_s25, %s34_s25 }
   0xc   :  { %p639_p3 = scmp.ne.s32.totalorder %s34_s25, %s638_s12  ;;  %p644_p5 = scmp.lt.s32.totalorder %s638_s12, %s638_s12 }
   0xe   :  { %p645_p6 = por %p644_p5, %p643_p4 }
  0x10   :  { %p646_p7 = pnand %p645_p6, %p639_p3 }
  0x12   :  { %649 = shalt.err (!%p646_p7)
}
  0x13   :  { %s748_s13 = smov 128   ;;  %s749_s14 = smov 8  }
  0x14   :  { %39 = dma.hbm_to_vmem [thread:$0]  %s894_s1, 512, %s34_s25, [#allocation6], %s748_s13, %s748_s13, %s749_s14  }
  0x15   :  { %s650_s19 = scalar_lea.hbm %s893_s0, 256 }
  0x16   :  { %p651_p8 = scmp.ne.s32.totalorder %s893_s0, %s650_s19  ;;  %p654_p9 = scmp.lt.u32.totalorder %s650_s19, %s893_s0 }
  0x18   :  { %p656_p10 = pnand %p654_p9, %p651_p8 }
  0x1a   :  { %659 = shalt.err (!%p656_p10)
}
  0x1b   :  { %s660_s24 = scalar_lea.vmem %s793_s27, 256  ;;  %p665_p12 = scmp.lt.s32.totalorder %s793_s27, %s793_s27 }
  0x1c   :  { %p661_p11 = scmp.ne.s32.totalorder %s793_s27, %s660_s24  ;;  %p666_p13 = scmp.lt.s32.totalorder %s660_s24, %s660_s24 }
  0x1e   :  { %p667_p0 = por %p666_p13, %p665_p12 }
  0x20   :  { %p668_p1 = pnand %p667_p0, %p661_p11 }
  0x22   :  { %671 = shalt.err (!%p668_p1)
}
  0x23   :  { %27 = dma.hbm_to_vmem [thread:$0]  %s893_s0, 256, %s793_s27, [#allocation3], %s748_s13, %s748_s13, %s749_s14  }
  0x24   :  { %s750_s26 = smov [#allocation7]   ;;  %s751_s29 = smov [#allocation8]  }
  0x25   :  { %s47_s28 = sshll.u32 %s750_s26, 4  ;;  %s61_s30 = sshll.u32 %s751_s29, 4  ;;  %s48_s28 = int_to_ptr.vmem [resolvable:$true] %s47_s28  ;;  %s830_s30 = int_to_ptr.vmem [resolvable:$true] %s61_s30 }
  0x26   :  { %s672_s10 = scalar_lea.hbm %s896_s3, 2048 }
  0x27   :  { %p673_p2 = scmp.ne.s32.totalorder %s896_s3, %s672_s10  ;;  %p676_p3 = scmp.lt.u32.totalorder %s672_s10, %s896_s3 }
  0x29   :  { %p678_p4 = pnand %p676_p3, %p673_p2 }
  0x2b   :  { %681 = shalt.err (!%p678_p4)
}
  0x2c   :  { %s682_s0 = scalar_lea.vmem %s48_s28, 2048  ;;  %p687_p6 = scmp.lt.s32.totalorder %s48_s28, %s48_s28 }
  0x2d   :  { %p683_p5 = scmp.ne.s32.totalorder %s48_s28, %s682_s0  ;;  %p688_p7 = scmp.lt.s32.totalorder %s682_s0, %s682_s0 }
  0x2f   :  { %p689_p8 = por %p688_p7, %p687_p6 }
  0x31   :  { %p690_p9 = pnand %p689_p8, %p683_p5 }
  0x33   :  { %693 = shalt.err (!%p690_p9)
}
  0x34   :  { %53 = dma.hbm_to_vmem [thread:$0]  %s896_s3, 2048, %s48_s28, [#allocation6], %s748_s13, %s748_s13, %s749_s14  }
  0x35   :  { %s694_s20 = scalar_lea.hbm %s898_s5, 2048 }
  0x36   :  { %p695_p10 = scmp.ne.s32.totalorder %s898_s5, %s694_s20  ;;  %p698_p11 = scmp.lt.u32.totalorder %s694_s20, %s898_s5 }
  0x38   :  { %p700_p12 = pnand %p698_p11, %p695_p10 }
  0x3a   :  { %703 = shalt.err (!%p700_p12)
}
  0x3b   :  { %s704_s1 = scalar_lea.vmem %s830_s30, 2048  ;;  %p709_p0 = scmp.lt.s32.totalorder %s830_s30, %s830_s30 }
  0x3c   :  { %p705_p13 = scmp.ne.s32.totalorder %s830_s30, %s704_s1  ;;  %p710_p1 = scmp.lt.s32.totalorder %s704_s1, %s704_s1 }
  0x3e   :  { %p711_p2 = por %p710_p1, %p709_p0 }
  0x40   :  { %p712_p3 = pnand %p711_p2, %p705_p13 }
  0x42   :  { %715 = shalt.err (!%p712_p3)
}
  0x43   :  { %67 = dma.hbm_to_vmem [thread:$0]  %s898_s5, 2048, %s830_s30, [#allocation9], %s748_s13, %s748_s13, %s749_s14  }
  0x44   :  { %738 = dma.done.wait [#allocation3], 256  }
  0x45   :  { %739 = vsyncadd [#allocation3], 4294967040 }
  0x46   :  { %740 = dma.done.wait [#allocation6], 2560  }
  0x47   :  { %741 = vsyncadd [#allocation6], 4294964736 }
  0x48   :  { %742 = dma.done.wait [#allocation9], 2048  }
  0x49   :  { %743 = vsyncadd [#allocation9], 4294965248  ;;  %vm95_vm0 = vcmask 261120   ;;  %v84_v0 = vld [vmem:[#allocation5] sm:$0xff]  ;;  %v85_v1 = vld [vmem:[#allocation5 + $0x8] sm:$0xff]  ;;  %vm389_vm1 = vcmask 130048  }
  0x4a   :  { %v86_v2 = vld [vmem:[#allocation5 + $0x10] sm:$0xff]  ;;  %v541_v3 = vpack.c.bf16 %v85_v1, %v84_v0  ;;  %v87_v4 = vld [vmem:[#allocation5 + $0x18] sm:$0xff]  ;;  %v179_v7 = vld [vmem:[#allocation7] sm:$0xff] }
  0x4b   :  { %v82_v5 = vld [vmem:[#allocation2] sm:$0xff]  ;;  %v545_v6 = vpack.c.bf16 %v87_v4, %v86_v2  ;;  %v180_v8 = vld [vmem:[#allocation7 + $0x8] sm:$0xff]  ;;  %v182_v11 = vld [vmem:[#allocation7 + $0x18] sm:$0xff] }
  0x4c   :  { %468 = vmatprep.mubr.msk.f32.mxu0 %vm95_vm0, %v82_v5  ;;  %v181_v9 = vld [vmem:[#allocation7 + $0x10] sm:$0xff]  ;;  %542 = vmatprep.subr.bf16.mxu0 %v541_v3  ;;  %v549_v10 = vpack.c.bf16 %v180_v8, %v179_v7  ;;  %v183_v13 = vld [vmem:[#allocation7 + $0x20] sm:$0xff]  ;;  %v184_v14 = vld [vmem:[#allocation7 + $0x28] sm:$0xff] }
  0x4d   :  { %544 = vmatpush3.bf16.msra.mxu0 %v541_v3  ;;  %v553_v12 = vpack.c.bf16 %v182_v11, %v181_v9  ;;  %v557_v15 = vpack.c.bf16 %v184_v14, %v183_v13  ;;  %v83_v16 = vld [vmem:[#allocation2 + $0x8] sm:$0xff]  ;;  %v185_v17 = vld [vmem:[#allocation7 + $0x30] sm:$0xff]  ;;  %v187_v20 = vld [vmem:[#allocation7 + $0x40] sm:$0xff] }
  0x4e   :  { %546 = vmatprep.subr.bf16.mxu0 %v545_v6  ;;  %550 = vmatprep.subr.bf16.mxu1 %v549_v10  ;;  %v186_v18 = vld [vmem:[#allocation7 + $0x38] sm:$0xff]  ;;  %v188_v21 = vld [vmem:[#allocation7 + $0x48] sm:$0xff]  ;;  %v189_v23 = vld [vmem:[#allocation7 + $0x50] sm:$0xff] }
  0x4f   :  { %552 = vmatpush3.bf16.msra.mxu1 %v549_v10  ;;  %v561_v19 = vpack.c.bf16 %v186_v18, %v185_v17  ;;  %v565_v22 = vpack.c.bf16 %v188_v21, %v187_v20  ;;  %v190_v24 = vld [vmem:[#allocation7 + $0x58] sm:$0xff]  ;;  %v191_v26 = vld [vmem:[#allocation7 + $0x60] sm:$0xff]  ;;  %v192_v27 = vld [vmem:[#allocation7 + $0x68] sm:$0xff] }
  0x50   :  { %554 = vmatprep.subr.bf16.mxu1 %v553_v12  ;;  %v569_v25 = vpack.c.bf16 %v190_v24, %v189_v23  ;;  %v573_v28 = vpack.c.bf16 %v192_v27, %v191_v26  ;;  %v193_v29 = vld [vmem:[#allocation7 + $0x70] sm:$0xff]  ;;  %v194_v30 = vld [vmem:[#allocation7 + $0x78] sm:$0xff]  ;;  %v279_v32 = vld [vmem:[#allocation8] sm:$0xff] }
  0x51   :  { %548 = vmatpush3.bf16.msra.mxu0 %v545_v6  ;;  %v577_v31 = vpack.c.bf16 %v194_v30, %v193_v29  ;;  %v280_v33 = vld [vmem:[#allocation8 + $0x8] sm:$0xff]  ;;  %v281_v34 = vld [vmem:[#allocation8 + $0x10] sm:$0xff]  ;;  %v282_v36 = vld [vmem:[#allocation8 + $0x18] sm:$0xff] }
  0x52   :  { %v581_v35 = vpack.c.bf16 %v280_v33, %v279_v32  ;;  %v585_v37 = vpack.c.bf16 %v282_v36, %v281_v34  ;;  %v283_v38 = vld [vmem:[#allocation8 + $0x20] sm:$0xff]  ;;  %v284_v39 = vld [vmem:[#allocation8 + $0x28] sm:$0xff]  ;;  %v285_v41 = vld [vmem:[#allocation8 + $0x30] sm:$0xff] }
  0x53   :  { %556 = vmatpush3.bf16.msra.mxu1 %v553_v12  ;;  %v589_v40 = vpack.c.bf16 %v284_v39, %v283_v38  ;;  %v286_v42 = vld [vmem:[#allocation8 + $0x38] sm:$0xff]  ;;  %v287_v44 = vld [vmem:[#allocation8 + $0x40] sm:$0xff]  ;;  %v288_v45 = vld [vmem:[#allocation8 + $0x48] sm:$0xff] }
  0x54   :  { %469 = vmatmul.mubr.msk.f32.vlgmr.msra.gmra.mrb[0].mxu0 %vm95_vm0, %v83_v16  ;;  %558 = vmatprep.subr.bf16.mxu1 %v557_v15  ;;  %v593_v43 = vpack.c.bf16 %v286_v42, %v285_v41  ;;  %v597_v46 = vpack.c.bf16 %v288_v45, %v287_v44  ;;  %v289_v47 = vld [vmem:[#allocation8 + $0x50] sm:$0xff]  ;;  %v290_v48 = vld [vmem:[#allocation8 + $0x58] sm:$0xff]  ;;  %v291_v50 = vld [vmem:[#allocation8 + $0x60] sm:$0xff] }
  0x55   :  { %582 = vmatprep.subr.bf16.mxu0 %v581_v35  ;;  %v601_v49 = vpack.c.bf16 %v290_v48, %v289_v47  ;;  %v292_v51 = vld [vmem:[#allocation8 + $0x68] sm:$0xff]  ;;  %v411_v53 = vld [vmem:[%s895_s2] ss:$0 sm:$0xff]  ;;  %v294_v61 = vld [vmem:[#allocation8 + $0x78] sm:$0xff] }
  0x56   :  { %584 = vmatpush3.bf16.msra.mxu0 %v581_v35  ;;  %v605_v52 = vpack.c.bf16 %v292_v51, %v291_v50  ;;  %v293_v60 = vld [vmem:[#allocation8 + $0x70] sm:$0xff] }
  0x57   :  { %560 = vmatpush3.bf16.msra.mxu1 %v557_v15  ;;  %586 = vmatprep.subr.bf16.mxu0 %v585_v37  ;;  %v609_v62 = vpack.c.bf16 %v294_v61, %v293_v60  ;;  %v414_v63 = vld [vmem:[%s897_s4] ss:$0 sm:$0xff]  ;;  %s752_s4 = smov [#allocation10]  }
  0x58   :  { %562 = vmatprep.subr.bf16.mxu1 %v561_v19  ;;  %v415_v6 = vld [vmem:[%s899_s6] ss:$0 sm:$0xff]  ;;  %s397_s8 = sshll.u32 %s752_s4, 4  ;;  %s398_s8 = int_to_ptr.vmem [resolvable:$true] %s397_s8 }
  0x59   :  { %s716_s6 = scalar_lea.vmem %s398_s8, 256  ;;  %p721_p5 = scmp.lt.s32.totalorder %s398_s8, %s398_s8 }
  0x5a   :  { %588 = vmatpush3.bf16.msra.mxu0 %v585_v37  ;;  %p717_p4 = scmp.ne.s32.totalorder %s398_s8, %s716_s6  ;;  %p722_p6 = scmp.lt.s32.totalorder %s716_s6, %s716_s6 }
  0x5b   :  { %564 = vmatpush3.bf16.msra.mxu1 %v561_v19  ;;  %590 = vmatprep.subr.bf16.mxu0 %v589_v40 }
  0x5c   :  { %566 = vmatprep.subr.bf16.mxu1 %v565_v22  ;;  %p723_p7 = por %p722_p6, %p721_p5 }
  0x5e   :  { %592 = vmatpush3.bf16.msra.mxu0 %v589_v40  ;;  %p724_p8 = pnand %p723_p7, %p717_p4 }
  0x5f   :  { %568 = vmatpush3.bf16.msra.mxu1 %v565_v22  ;;  %594 = vmatprep.subr.bf16.mxu0 %v593_v43 }
  0x60   :  { %570 = vmatprep.subr.bf16.mxu1 %v569_v25 }
  0x62   :  { %596 = vmatpush3.bf16.msra.mxu0 %v593_v43 }
  0x63   :  { %572 = vmatpush3.bf16.msra.mxu1 %v569_v25  ;;  %598 = vmatprep.subr.bf16.mxu0 %v597_v46 }
  0x64   :  { %574 = vmatprep.subr.bf16.mxu1 %v573_v28 }
  0x66   :  { %600 = vmatpush3.bf16.msra.mxu0 %v597_v46 }
  0x67   :  { %576 = vmatpush3.bf16.msra.mxu1 %v573_v28  ;;  %602 = vmatprep.subr.bf16.mxu0 %v601_v49 }
  0x68   :  { %578 = vmatprep.subr.bf16.mxu1 %v577_v31 }
  0x6a   :  { %604 = vmatpush3.bf16.msra.mxu0 %v601_v49 }
  0x6b   :  { %580 = vmatpush3.bf16.msra.mxu1 %v577_v31  ;;  %606 = vmatprep.subr.bf16.mxu0 %v605_v52 }
  0x6e   :  { %608 = vmatpush3.bf16.msra.mxu0 %v605_v52 }
  0x6f   :  { %610 = vmatprep.subr.bf16.mxu0 %v609_v62 }
  0x72   :  { %612 = vmatpush3.bf16.msra.mxu0 %v609_v62 }
 0x127   :  { %v470_v54 = vpop.f32.mrb[0].mxu0 }
 0x128   :  { %v174_v55 = vadd.f32 %v470_v54, %v411_v53  ;;  %v168_v56 = vpop.f32.mrb[1].mxu0 }
 0x129   :  { %v169_v57 = vadd.f32 %v411_v53, %v168_v56 }
 0x12a   :  { %v178_v59 = vmax.f32 %v174_v55, 0.0 }
 0x12b   :  { %v177_v58 = vmax.f32 %v169_v57, 0.0 }
 0x12d   :  { %503 = vmatprep.mubr.f32.mxu1 %v177_v58 }
 0x12e   :  { %504 = vmatmul.mubr.f32.vlgmr.msra.gmra.mrb[0].mxu1 %v178_v59 }
 0x201   :  { %v505_v0 = vpop.f32.mrb[0].mxu1 }
 0x202   :  { %v274_v1 = vadd.f32 %v505_v0, %v414_v63  ;;  %v268_v2 = vpop.f32.mrb[1].mxu1 }
 0x203   :  { %v269_v3 = vadd.f32 %v414_v63, %v268_v2 }
 0x204   :  { %v278_v5 = vmax.f32 %v274_v1, 0.0 }
 0x205   :  { %v277_v4 = vmax.f32 %v269_v3, 0.0 }
 0x207   :  { %538 = vmatprep.mubr.f32.mxu0 %v277_v4 }
 0x208   :  { %539 = vmatmul.mubr.f32.vlgmr.msra.gmra.mrb[2].mxu0 %v278_v5 }
 0x2db   :  { %v540_v7 = vpop.f32.mrb[2].mxu0 }
 0x2dc   :  { %v374_v8 = vadd.f32 %v540_v7, %v415_v6  ;;  %v368_v9 = vpop.f32.mrb[3].mxu0 }
 0x2dd   :  { %v369_v10 = vadd.f32 %v415_v6, %v368_v9 }
 0x2de   :  { %v417_v11 = vmul.f32 -1.442695, %v374_v8 }
 0x2df   :  { %v416_v12 = vmul.f32 -1.442695, %v369_v10 }
 0x2e0   :  { %620 = vpow2.f32 %v417_v11 }
 0x2e1   :  { %622 = vpow2.f32 %v416_v12 }
 0x2ea   :  { %v621_v13 = vpop.eup %620 }
 0x2eb   :  { %v623_v14 = vpop.eup %622  ;;  %v384_v15 = vadd.f32 1.0, %v621_v13 }
 0x2ec   :  { %v383_v16 = vadd.f32 1.0, %v623_v14 }
 0x2ed   :  { %624 = vrcp.f32 %v384_v15 }
 0x2ee   :  { %626 = vrcp.f32 %v383_v16 }
 0x2f7   :  { %v625_v17 = vpop.eup %624 }
 0x2f8   :  { %v627_v18 = vpop.eup %626  ;;  %391 = vst.msk [vmem:[#allocation10 + $0x8] sm:$0xff] %vm389_vm1, %v625_v17 }
 0x2f9   :  { %390 = vst.msk [vmem:[#allocation10] sm:$0xff] %vm389_vm1, %v627_v18 }
 0x2fa   :  { %727 = shalt.err (!%p724_p8)
}
 0x2fb   :  { %s728_s11 = scalar_lea.hbm %s900_s7, 256 }
 0x2fc   :  { %p729_p9 = scmp.ne.s32.totalorder %s900_s7, %s728_s11  ;;  %p732_p10 = scmp.lt.u32.totalorder %s728_s11, %s900_s7 }
 0x2fe   :  { %p734_p11 = pnand %p732_p10, %p729_p9 }
 0x300   :  { %737 = shalt.err (!%p734_p11)
}
 0x301   :  { %403 = dma.vmem_to_hbm [thread:$0]  %s398_s8, 256, %s900_s7, [#allocation4], %s748_s13, %s748_s13, %s749_s14  }
 0x302   :  { %744 = dma.done.wait [#allocation4], 256  }
 0x303   :  { %745 = vsyncadd [#allocation4], 4294967040 }
 0x304   :  { %407 = vsyncpa [#allocation3], 1 }
 0x305   :  { %408 = vsyncpa [#allocation6], 1 }
 0x306   :  { %409 = vsyncpa [#allocation9], 1 }
 0x307   :  { %410 = vsyncpa [#allocation4], 1 }

</bundles_post_ra>
